<compile_context>
chip_gen: v7x
topology: tpu7x:2x2x1
jax: 0.10.0
libtpu: 0.0.40
codegen_flags: <defaults>
</compile_context>

<pallas_src>
import numpy as np
import jax
import jax.numpy as jnp
from jax import lax
from jax.experimental import pallas as pl
from jax.experimental.pallas import tpu as pltpu


_LANE = 512          # lane width of the elementwise quant / calibration kernels
_NUM_CAND = 80       # MSE range-search candidates (matches the PyTorch loop)
_P_WIDTH = 20        # per-candidate / per-tensor quant parameter vector width
# params vector layout (f32[_P_WIDTH]):
#   [0:4]   delta   a..d        [4:8]   1/delta a..d
#   [8:12]  zero_pt a..d        [12:15] step a,b,c
#   [15]    maxi    [16] mini   [17]    n_levels-1   [18:20] padding


# ---------------------------------------------------------------------------
# Shared piecewise-quant math (used by kernels AND the pure-JAX references)
# ---------------------------------------------------------------------------

def _apply_piecewise(x, get):
    """4-segment piecewise uniform affine quant (UniformAffineQuantizer.forward).

    `get(j)` returns scalar j of the params layout above.  One round/clip pass with
    per-element (delta, 1/delta, zero_point) chosen by 3 compares, then a single
    in-range select.  Out-of-range values and values exactly on a segment boundary
    pass through, matching the strict inequalities of the PyTorch reference.
    NOTE: x * (1/delta) replaces x / delta (per review); this can differ from the
    PyTorch divide only on exact .5 rounding ties.
    """
    da, db, dc, dd = get(0), get(1), get(2), get(3)
    ia, ib, ic, idd = get(4), get(5), get(6), get(7)
    za, zb, zc, zd = get(8), get(9), get(10), get(11)
    sa, sb, sc = get(12), get(13), get(14)
    mx, mn, nlm1 = get(15), get(16), get(17)
    lt_a = x < sa
    lt_b = x < sb
    lt_c = x < sc
    delta = jnp.where(lt_a, da, jnp.where(lt_b, db, jnp.where(lt_c, dc, dd)))
    inv_d = jnp.where(lt_a, ia, jnp.where(lt_b, ib, jnp.where(lt_c, ic, idd)))
    zp = jnp.where(lt_a, za, jnp.where(lt_b, zb, jnp.where(lt_c, zc, zd)))
    q = (jnp.clip(jnp.round(x * inv_d) + zp, 0.0, nlm1) - zp) * delta
    in_range = (mn < x) & (x < mx) & (x != sa) & (x != sb) & (x != sc)
    return jnp.where(in_range, q, x)


def _candidate_table(x_max, x_min, n_levels):
    """(NUM_CAND, P_WIDTH) f32 quant params for the 80 candidate clipping ranges."""
    nlm1 = jnp.full((_NUM_CAND,), n_levels - 1, jnp.float32)
    f = jnp.asarray(1.0 - np.arange(_NUM_CAND) * 0.01, jnp.float32)
    mx = x_max * f
    mn = x_min * f
    step = (mx - mn) * 0.25
    sa = mn + step
    sb = sa + step
    sc = sb + step
    da = (sa - mn) / nlm1
    db = (sb - sa) / nlm1
    dc = (sc - sb) / nlm1
    dd = (mx - sc) / nlm1
    za = jnp.round(-mn / da)
    zb = jnp.round(-sa / db)
    zc = jnp.round(-sb / dc)
    zd = jnp.round(-sc / dd)
    zeros = jnp.zeros_like(f)
    return jnp.stack(
        [da, db, dc, dd,
         1.0 / da, 1.0 / db, 1.0 / dc, 1.0 / dd,
         za, zb, zc, zd,
         sa, sb, sc, mx, mn, nlm1, zeros, zeros], axis=1).astype(jnp.float32)


# ---------------------------------------------------------------------------
# Pallas kernels
# ---------------------------------------------------------------------------

def _quant_kernel(p_ref, x_ref, o_ref):
    """Piecewise quantize one (tr, LANE) tile.  p_ref: SMEM f32[_P_WIDTH]."""
    o_ref[...] = _apply_piecewise(x_ref[...], lambda j: p_ref[j])


def _mse_calib_kernel(tbl_ref, x_ref, o_ref, acc_ref):
    """Streaming MSE range search ('mse' scale_method).

    tbl_ref : SMEM f32[NUM_CAND * P_WIDTH]  per-candidate quant params
    x_ref   : VMEM (tr, LANE) zero-padded data tile (zeros quantize to zero => no bias)
    o_ref   : VMEM (NUM_CAND, LANE) per-candidate per-lane sums of |x - x_q|^2.4
    acc_ref : VMEM scratch accumulator (persists across the sequential grid)
    """
    @pl.when(pl.program_id(0) == 0)
    def _():
        acc_ref[...] = jnp.zeros_like(acc_ref)

    x = x_ref[...]

    def body(i, carry):
        base = i * _P_WIDTH
        xq = _apply_piecewise(x, lambda j: tbl_ref[base + j])
        err = jnp.abs(x - xq)
        # |err| ** 2.4 (lp_loss p=2.4), guarded at err == 0
        p = jnp.where(err > 0.0, jnp.exp(2.4 * jnp.log(err)), 0.0)
        part = jnp.sum(p, axis=0, keepdims=True)                    # (1, LANE)
        acc_ref[pl.ds(i, 1), :] = acc_ref[pl.ds(i, 1), :] + part
        return carry

    lax.fori_loop(0, _NUM_CAND, body, 0)

    @pl.when(pl.program_id(0) == pl.num_programs(0) - 1)
    def _():
        o_ref[...] = acc_ref[...]


def _conv_mm_kernel(p_ref, w_ref, b_ref, o_ref, acc_ref):
    """im2col conv as K-tiled matmul + bias.  p:(tm,tk) w:(tk,tn) b:(1,tn) o:(tm,tn)."""
    @pl.when(pl.program_id(2) == 0)
    def _():
        acc_ref[...] = jnp.zeros_like(acc_ref)

    acc_ref[...] += jnp.dot(p_ref[...], w_ref[...], preferred_element_type=jnp.float32)

    @pl.when(pl.program_id(2) == pl.num_programs(2) - 1)
    def _():
        o_ref[...] = (acc_ref[...] + b_ref[...]).astype(o_ref.dtype)


# ---------------------------------------------------------------------------
# Pallas wrappers
# ---------------------------------------------------------------------------

def _as_lane_matrix(flat):
    """Zero-pad a flat f32 vector into a (rows, _LANE) matrix; return (matrix, row_tile)."""
    n = flat.shape[0]
    rows = pl.cdiv(n, _LANE)
    rows8 = pl.cdiv(rows, 8) * 8
    tr = min(256, rows8)                       # row-tile: up to (256, 512) = 512 KiB
    rows_p = pl.cdiv(rows8, tr) * tr
    flat = jnp.pad(flat, (0, rows_p * _LANE - n))
    return flat.reshape(rows_p, _LANE), tr


def quant_apply_pallas(x, params):
    """Apply the 4-segment quantization elementwise to an arbitrary-shape f32 array."""
    orig_shape = x.shape
    flat = x.astype(jnp.float32).reshape(-1)
    n = flat.shape[0]
    mat, tr = _as_lane_matrix(flat)
    rows = mat.shape[0]
    out = pl.pallas_call(
        _quant_kernel,
        out_shape=jax.ShapeDtypeStruct(mat.shape, jnp.float32),
        grid=(rows // tr,),
        in_specs=[
            pl.BlockSpec(memory_space=pltpu.MemorySpace.SMEM),       # quant params
            pl.BlockSpec((tr, _LANE), lambda i: (i, 0)),
        ],
        out_specs=pl.BlockSpec((tr, _LANE), lambda i: (i, 0)),
        compiler_params=pltpu.CompilerParams(dimension_semantics=("parallel",)),
    )(params, mat)
    return out.reshape(-1)[:n].reshape(orig_shape)


def _mse_scores_pallas(x, n_levels):
    """One-pass streaming scores for the 80 candidate ranges. Returns (scores, table)."""
    flat = x.astype(jnp.float32).reshape(-1)
    n = flat.shape[0]
    x_max = jnp.max(flat)
    x_min = jnp.min(flat)
    tbl = _candidate_table(x_max, x_min, n_levels)                    # (80, 20)
    mat, tr = _as_lane_matrix(flat)
    rows = mat.shape[0]
    lane_sums = pl.pallas_call(
        _mse_calib_kernel,
        out_shape=jax.ShapeDtypeStruct((_NUM_CAND, _LANE), jnp.float32),
        grid=(rows // tr,),
        in_specs=[
            pl.BlockSpec(memory_space=pltpu.MemorySpace.SMEM),        # candidate table
            pl.BlockSpec((tr, _LANE), lambda i: (i, 0)),
        ],
        out_specs=pl.BlockSpec((_NUM_CAND, _LANE), lambda i: (0, 0)),  # resident accum
        scratch_shapes=[pltpu.VMEM((_NUM_CAND, _LANE), jnp.float32)],
        compiler_params=pltpu.CompilerParams(dimension_semantics=("arbitrary",)),
    )(tbl.reshape(-1), mat)
    scores = jnp.sum(lane_sums, axis=1) / jnp.float32(n)              # lp_loss mean
    return scores, tbl


def mse_init_params(x, n_bits=8):
    """UniformAffineQuantizer.init_quantization_scale (scale_method='mse')."""
    n_levels = 2 ** n_bits
    scores, tbl = _mse_scores_pallas(x, n_levels)
    best = jnp.argmin(scores)                  # first minimum == PyTorch '<' loop
    return tbl[best]


def _im2col(x, kh, kw, stride, padding):
    """x: (N,C,H,W) -> patches (N*OH*OW, C*KH*KW), channel-major reduction axis."""
    n, c, h, w = x.shape
    xp = jnp.pad(x, ((0, 0), (0, 0), (padding, padding), (padding, padding)))
    oh = (h + 2 * padding - kh) // stride + 1
    ow = (w + 2 * padding - kw) // stride + 1
    cols = []
    for i in range(kh):
        for j in range(kw):
            cols.append(xp[:, :, i:i + stride * oh:stride, j:j + stride * ow:stride])
    patches = jnp.stack(cols, axis=0)              # (KH*KW, N, C, OH, OW)
    patches = patches.transpose(1, 3, 4, 2, 0)     # (N, OH, OW, C, KH*KW)
    return patches.reshape(n * oh * ow, c * kh * kw), oh, ow


def _pick_k_tile(k):
    for cand in (1024, 512, 256, 128):
        if k % cand == 0:
            return cand
    return k                                        # small K: take the whole axis


def conv2d_pallas(x, weight, bias, *, stride=1, padding=1):
    """F.conv2d (symmetric stride/pad, dilation=1, groups=1) via Pallas matmul."""
    n, c, h, w = x.shape
    oc, _, kh, kw = weight.shape
    if bias is None:
        bias = jnp.zeros((oc,), x.dtype)
    patches, oh, ow = _im2col(x, kh, kw, stride, padding)
    m, k = patches.shape

    oc_p = pl.cdiv(oc, 128) * 128                  # lane-dense output columns
    tm = 512 if m >= 512 else pl.cdiv(m, 8) * 8
    tn = 256 if oc_p % 256 == 0 else 128
    tk = _pick_k_tile(k)

    mp = pl.cdiv(m, tm) * tm
    patches = jnp.pad(patches, ((0, mp - m), (0, 0)))
    w2 = jnp.pad(weight.reshape(oc, k).T, ((0, 0), (0, oc_p - oc)))   # (K, OCpad)
    b2 = jnp.pad(bias.reshape(1, oc), ((0, 0), (0, oc_p - oc)))       # (1, OCpad)

    out = pl.pallas_call(
        _conv_mm_kernel,
        out_shape=jax.ShapeDtypeStruct((mp, oc_p), jnp.float32),
        grid=(mp // tm, oc_p // tn, k // tk),
        in_specs=[
            pl.BlockSpec((tm, tk), lambda i, j, kk: (i, kk)),
            pl.BlockSpec((tk, tn), lambda i, j, kk: (kk, j)),
            pl.BlockSpec((1, tn), lambda i, j, kk: (0, j)),
        ],
        out_specs=pl.BlockSpec((tm, tn), lambda i, j, kk: (i, j)),
        scratch_shapes=[pltpu.VMEM((tm, tn), jnp.float32)],
        compiler_params=pltpu.CompilerParams(
            dimension_semantics=("parallel", "parallel", "arbitrary"),
            vmem_limit_bytes=32 * 1024 * 1024),
    )(patches, w2, b2)

    out = out[:m, :oc].reshape(n, oh, ow, oc).transpose(0, 3, 1, 2)   # back to NCHW
    return out


# ---------------------------------------------------------------------------
# Pure-JAX references (for the in-script sanity checks)
# ---------------------------------------------------------------------------

def _quant_apply_ref(x, params):
    return _apply_piecewise(x.astype(jnp.float32), lambda j: params[j])


def _mse_scores_ref(x, n_levels):
    xf = x.astype(jnp.float32).reshape(-1)
    tbl = _candidate_table(jnp.max(xf), jnp.min(xf), n_levels)

    def one(row):
        xq = _apply_piecewise(xf, lambda j: row[j])
        err = jnp.abs(xf - xq)
        p = jnp.where(err > 0.0, jnp.exp(2.4 * jnp.log(err)), 0.0)
        return jnp.mean(p)

    return jax.vmap(one)(tbl)


# ---------------------------------------------------------------------------
# QuantModule.forward
# ---------------------------------------------------------------------------

def quant_module_forward(x, weight, bias, *, use_weight_quant=True, use_act_quant=True,
                         disable_act_quant=False, n_bits=8, stride=1, padding=1):
    if use_weight_quant:
        w_params = mse_init_params(weight, n_bits)      # weight_quantizer first-call init
        wq = quant_apply_pallas(weight, w_params)       # weight_quantizer(weight)
    else:
        wq = weight
    out = conv2d_pallas(x, wq, bias, stride=stride, padding=padding)  # fwd_func = F.conv2d
    # se_module is None; activation_function = StraightThrough (identity)
    if disable_act_quant:
        return out
    if use_act_quant:
        a_params = mse_init_params(out, n_bits)         # act_quantizer first-call init
        out = quant_apply_pallas(out, a_params)         # act_quantizer(out)
    return out


if __name__ == "__main__":
    key = jax.random.PRNGKey(0)
    kx, kw_, kb = jax.random.split(key, 3)

    N, C, H, W = 2, 4, 16, 16
    OC, KH, KW = 8, 3, 3

    x = jax.random.normal(kx, (N, C, H, W), jnp.float32)
    weight = jax.random.normal(kw_, (OC, C, KH, KW), jnp.float32) * 0.1
    bias = jax.random.normal(kb, (OC,), jnp.float32) * 0.1

    # --- calibration kernel vs plain-JAX reference scores ---
    s_kernel, _ = _mse_scores_pallas(weight, 256)
    s_ref = _mse_scores_ref(weight, 256)
    assert jnp.allclose(s_kernel, s_ref, rtol=1e-3, atol=1e-12), "calibration score mismatch"

    # --- weight quantization kernel vs reference ---
    w_params = mse_init_params(weight, 8)
    w_q = quant_apply_pallas(weight, w_params)
    w_q_ref = _quant_apply_ref(weight, w_params)
    assert jnp.allclose(w_q, w_q_ref, atol=1e-5, rtol=1e-5), "weight quant mismatch"

    # --- conv kernel vs lax reference ---
    conv_k = conv2d_pallas(x, w_q, bias, stride=1, padding=1)
    conv_r = lax.conv_general_dilated(
        x, w_q, window_strides=(1, 1), padding=((1, 1), (1, 1)),
        dimension_numbers=("NCHW", "OIHW", "NCHW")) + bias[None, :, None, None]
    assert conv_k.shape == (N, OC, H, W)
    assert jnp.allclose(conv_k, conv_r, atol=1e-3, rtol=1e-3), "conv mismatch"

    # --- full QuantModule forward (weight quant + conv + act quant) ---
    fwd = jax.jit(lambda xi, wi, bi: quant_module_forward(
        xi, wi, bi, use_weight_quant=True, use_act_quant=True, disable_act_quant=False))
    out = jax.block_until_ready(fwd(x, weight, bias))
    assert out.shape == (N, OC, H, W)
    assert out.dtype == jnp.float32

    a_params = mse_init_params(conv_k, 8)
    out_ref = _quant_apply_ref(conv_k, a_params)
    assert jnp.allclose(out, out_ref, atol=1e-5, rtol=1e-5), "forward mismatch"

    print("KERNEL_OK")
</pallas_src>

<mosaic_0001>
module attributes {stable_mosaic.version = 11 : i64} {
  func.func @_mse_calib_kernel(%arg0: i32, %arg1: memref<1600xf32, #tpu.memory_space<smem>>, %arg2: memref<8x512xf32, #tpu.memory_space<vmem>>, %arg3: memref<80x512xf32, #tpu.memory_space<vmem>>, %arg4: memref<80x512xf32, #tpu.memory_space<vmem>>) attributes {dimension_semantics = [#tpu.dimension_semantics<arbitrary>], iteration_bounds = array<i64: 1>, scalar_prefetch = 0 : i64, scratch_operands = 1 : i64, tpu.core_type = #tpu.core_type<tc>, window_params = [{transform_indices = @transform_0, window_bounds = array<i64: 1600>}, {transform_indices = @transform_1, window_bounds = array<i64: 8, 512>}, {pipeline_mode = #tpu.pipeline_mode<synchronous>, transform_indices = @transform_2, window_bounds = array<i64: 80, 512>}]} {
    %c0_i32 = arith.constant 0 : i32
    %0 = arith.cmpi eq, %arg0, %c0_i32 : i32
    %1 = arith.extui %0 : i1 to i32
    %c0_i32_0 = arith.constant 0 : i32
    %2 = arith.cmpi ne, %1, %c0_i32_0 : i32
    scf.if %2 {
      %cst = arith.constant 0.000000e+00 : f32
      %8 = vector.broadcast %cst : f32 to vector<80x512xf32>
      %c0_6 = arith.constant 0 : index
      %c0_7 = arith.constant 0 : index
      %9 = vector.load %arg4[%c0_6, %c0_7] : memref<80x512xf32, #tpu.memory_space<vmem>>, vector<80x512xf32>
      tpu.vector_store %arg4[%c0_6, %c0_7], %8 {strides = array<i32>} : memref<80x512xf32, #tpu.memory_space<vmem>>, vector<80x512xf32>,
    } else {
    }
    %c0 = arith.constant 0 : index
    %c0_1 = arith.constant 0 : index
    %3 = vector.load %arg2[%c0, %c0_1] : memref<8x512xf32, #tpu.memory_space<vmem>>, vector<8x512xf32>
    %c0_i32_2 = arith.constant 0 : i32
    %c80_i32 = arith.constant 80 : i32
    %4 = arith.addi %c0_i32_2, %c80_i32 : i32
    %c1_i32 = arith.constant 1 : i32
    scf.for %arg5 = %c0_i32_2 to %4 step %c1_i32  : i32 {
      %c20_i32 = arith.constant 20 : i32
      %8 = arith.muli %arg5, %c20_i32 : i32
      %c0_i32_6 = arith.constant 0 : i32
      %9 = arith.addi %8, %c0_i32_6 : i32
      %10 = arith.index_cast %9 : i32 to index
      %11 = memref.load %arg1[%10] : memref<1600xf32, #tpu.memory_space<smem>>
      %c1_i32_7 = arith.constant 1 : i32
      %12 = arith.addi %8, %c1_i32_7 : i32
      %13 = arith.index_cast %12 : i32 to index
      %14 = memref.load %arg1[%13] : memref<1600xf32, #tpu.memory_space<smem>>
      %c2_i32 = arith.constant 2 : i32
      %15 = arith.addi %8, %c2_i32 : i32
      %16 = arith.index_cast %15 : i32 to index
      %17 = memref.load %arg1[%16] : memref<1600xf32, #tpu.memory_space<smem>>
      %c3_i32 = arith.constant 3 : i32
      %18 = arith.addi %8, %c3_i32 : i32
      %19 = arith.index_cast %18 : i32 to index
      %20 = memref.load %arg1[%19] : memref<1600xf32, #tpu.memory_space<smem>>
      %c4_i32 = arith.constant 4 : i32
      %21 = arith.addi %8, %c4_i32 : i32
      %22 = arith.index_cast %21 : i32 to index
      %23 = memref.load %arg1[%22] : memref<1600xf32, #tpu.memory_space<smem>>
      %c5_i32 = arith.constant 5 : i32
      %24 = arith.addi %8, %c5_i32 : i32
      %25 = arith.index_cast %24 : i32 to index
      %26 = memref.load %arg1[%25] : memref<1600xf32, #tpu.memory_space<smem>>
      %c6_i32 = arith.constant 6 : i32
      %27 = arith.addi %8, %c6_i32 : i32
      %28 = arith.index_cast %27 : i32 to index
      %29 = memref.load %arg1[%28] : memref<1600xf32, #tpu.memory_space<smem>>
      %c7_i32 = arith.constant 7 : i32
      %30 = arith.addi %8, %c7_i32 : i32
      %31 = arith.index_cast %30 : i32 to index
      %32 = memref.load %arg1[%31] : memref<1600xf32, #tpu.memory_space<smem>>
      %c8_i32 = arith.constant 8 : i32
      %33 = arith.addi %8, %c8_i32 : i32
      %34 = arith.index_cast %33 : i32 to index
      %35 = memref.load %arg1[%34] : memref<1600xf32, #tpu.memory_space<smem>>
      %c9_i32 = arith.constant 9 : i32
      %36 = arith.addi %8, %c9_i32 : i32
      %37 = arith.index_cast %36 : i32 to index
      %38 = memref.load %arg1[%37] : memref<1600xf32, #tpu.memory_space<smem>>
      %c10_i32 = arith.constant 10 : i32
      %39 = arith.addi %8, %c10_i32 : i32
      %40 = arith.index_cast %39 : i32 to index
      %41 = memref.load %arg1[%40] : memref<1600xf32, #tpu.memory_space<smem>>
      %c11_i32 = arith.constant 11 : i32
      %42 = arith.addi %8, %c11_i32 : i32
      %43 = arith.index_cast %42 : i32 to index
      %44 = memref.load %arg1[%43] : memref<1600xf32, #tpu.memory_space<smem>>
      %c12_i32 = arith.constant 12 : i32
      %45 = arith.addi %8, %c12_i32 : i32
      %46 = arith.index_cast %45 : i32 to index
      %47 = memref.load %arg1[%46] : memref<1600xf32, #tpu.memory_space<smem>>
      %c13_i32 = arith.constant 13 : i32
      %48 = arith.addi %8, %c13_i32 : i32
      %49 = arith.index_cast %48 : i32 to index
      %50 = memref.load %arg1[%49] : memref<1600xf32, #tpu.memory_space<smem>>
      %c14_i32 = arith.constant 14 : i32
      %51 = arith.addi %8, %c14_i32 : i32
      %52 = arith.index_cast %51 : i32 to index
      %53 = memref.load %arg1[%52] : memref<1600xf32, #tpu.memory_space<smem>>
      %c15_i32 = arith.constant 15 : i32
      %54 = arith.addi %8, %c15_i32 : i32
      %55 = arith.index_cast %54 : i32 to index
      %56 = memref.load %arg1[%55] : memref<1600xf32, #tpu.memory_space<smem>>
      %c16_i32 = arith.constant 16 : i32
      %57 = arith.addi %8, %c16_i32 : i32
      %58 = arith.index_cast %57 : i32 to index
      %59 = memref.load %arg1[%58] : memref<1600xf32, #tpu.memory_space<smem>>
      %c17_i32 = arith.constant 17 : i32
      %60 = arith.addi %8, %c17_i32 : i32
      %61 = arith.index_cast %60 : i32 to index
      %62 = memref.load %arg1[%61] : memref<1600xf32, #tpu.memory_space<smem>>
      %63 = vector.broadcast %47 : f32 to vector<8x512xf32>
      %64 = arith.cmpf olt, %3, %63 : vector<8x512xf32>
      %65 = vector.broadcast %50 : f32 to vector<8x512xf32>
      %66 = arith.cmpf olt, %3, %65 : vector<8x512xf32>
      %67 = vector.broadcast %53 : f32 to vector<8x512xf32>
      %68 = arith.cmpf olt, %3, %67 : vector<8x512xf32>
      %69 = vector.broadcast %17 : f32 to vector<8x512xf32>
      %70 = vector.broadcast %20 : f32 to vector<8x512xf32>
      %71 = arith.select %68, %69, %70 : vector<8x512xi1>, vector<8x512xf32>
      %72 = vector.broadcast %14 : f32 to vector<8x512xf32>
      %73 = arith.select %66, %72, %71 : vector<8x512xi1>, vector<8x512xf32>
      %74 = vector.broadcast %11 : f32 to vector<8x512xf32>
      %75 = arith.select %64, %74, %73 : vector<8x512xi1>, vector<8x512xf32>
      %76 = vector.broadcast %29 : f32 to vector<8x512xf32>
      %77 = vector.broadcast %32 : f32 to vector<8x512xf32>
      %78 = arith.select %68, %76, %77 : vector<8x512xi1>, vector<8x512xf32>
      %79 = vector.broadcast %26 : f32 to vector<8x512xf32>
      %80 = arith.select %66, %79, %78 : vector<8x512xi1>, vector<8x512xf32>
      %81 = vector.broadcast %23 : f32 to vector<8x512xf32>
      %82 = arith.select %64, %81, %80 : vector<8x512xi1>, vector<8x512xf32>
      %83 = vector.broadcast %41 : f32 to vector<8x512xf32>
      %84 = vector.broadcast %44 : f32 to vector<8x512xf32>
      %85 = arith.select %68, %83, %84 : vector<8x512xi1>, vector<8x512xf32>
      %86 = vector.broadcast %38 : f32 to vector<8x512xf32>
      %87 = arith.select %66, %86, %85 : vector<8x512xi1>, vector<8x512xf32>
      %88 = vector.broadcast %35 : f32 to vector<8x512xf32>
      %89 = arith.select %64, %88, %87 : vector<8x512xi1>, vector<8x512xf32>
      %90 = arith.mulf %3, %82 : vector<8x512xf32>
      %91 = math.roundeven %90 : vector<8x512xf32>
      %92 = arith.addf %91, %89 : vector<8x512xf32>
      %cst = arith.constant 0.000000e+00 : f32
      %93 = vector.broadcast %cst : f32 to vector<8x512xf32>
      %94 = arith.maximumf %93, %92 : vector<8x512xf32>
      %95 = vector.broadcast %62 : f32 to vector<8x512xf32>
      %96 = arith.minimumf %95, %94 : vector<8x512xf32>
      %97 = arith.subf %96, %89 : vector<8x512xf32>
      %98 = arith.mulf %97, %75 : vector<8x512xf32>
      %99 = vector.broadcast %59 : f32 to vector<8x512xf32>
      %100 = arith.cmpf olt, %99, %3 : vector<8x512xf32>
      %101 = vector.broadcast %56 : f32 to vector<8x512xf32>
      %102 = arith.cmpf olt, %3, %101 : vector<8x512xf32>
      %103 = arith.andi %100, %102 : vector<8x512xi1>
      %104 = vector.broadcast %47 : f32 to vector<8x512xf32>
      %105 = arith.cmpf one, %3, %104 : vector<8x512xf32>
      %106 = arith.andi %103, %105 : vector<8x512xi1>
      %107 = vector.broadcast %50 : f32 to vector<8x512xf32>
      %108 = arith.cmpf one, %3, %107 : vector<8x512xf32>
      %109 = arith.andi %106, %108 : vector<8x512xi1>
      %110 = vector.broadcast %53 : f32 to vector<8x512xf32>
      %111 = arith.cmpf one, %3, %110 : vector<8x512xf32>
      %112 = arith.andi %109, %111 : vector<8x512xi1>
      %113 = arith.select %112, %98, %3 : vector<8x512xi1>, vector<8x512xf32>
      %114 = arith.subf %3, %113 : vector<8x512xf32>
      %115 = math.absf %114 : vector<8x512xf32>
      %cst_8 = arith.constant 0.000000e+00 : f32
      %116 = vector.broadcast %cst_8 : f32 to vector<8x512xf32>
      %117 = arith.cmpf ogt, %115, %116 : vector<8x512xf32>
      %118 = math.log %115 : vector<8x512xf32>
      %cst_9 = arith.constant 2.400000e+00 : f32
      %119 = vector.broadcast %cst_9 : f32 to vector<8x512xf32>
      %120 = arith.mulf %119, %118 : vector<8x512xf32>
      %121 = math.exp %120 : vector<8x512xf32>
      %cst_10 = arith.constant 0.000000e+00 : f32
      %122 = vector.broadcast %cst_10 : f32 to vector<8x512xf32>
      %123 = arith.select %117, %121, %122 : vector<8x512xi1>, vector<8x512xf32>
      %cst_11 = arith.constant dense<0.000000e+00> : vector<512xf32>
      %124 = vector.multi_reduction <add>, %123, %cst_11 [0] : vector<8x512xf32> to vector<512xf32>
      %125 = vector.shape_cast %124 : vector<512xf32> to vector<1x512xf32>
      %126 = arith.index_cast %arg5 : i32 to index
      %c0_12 = arith.constant 0 : index
      %127 = vector.load %arg4[%126, %c0_12] : memref<80x512xf32, #tpu.memory_space<vmem>>, vector<1x512xf32>
      %128 = arith.addf %127, %125 : vector<1x512xf32>
      %129 = arith.index_cast %arg5 : i32 to index
      %c0_13 = arith.constant 0 : index
      %130 = vector.load %arg4[%129, %c0_13] : memref<80x512xf32, #tpu.memory_space<vmem>>, vector<1x512xf32>
      tpu.vector_store %arg4[%129, %c0_13], %128 {strides = array<i32>} : memref<80x512xf32, #tpu.memory_space<vmem>>, vector<1x512xf32>,
    }
    %c80_i32_3 = arith.constant 80 : i32
    %c0_i32_4 = arith.constant 0 : i32
    %5 = arith.cmpi eq, %arg0, %c0_i32_4 : i32
    %6 = arith.extui %5 : i1 to i32
    %c0_i32_5 = arith.constant 0 : i32
    %7 = arith.cmpi ne, %6, %c0_i32_5 : i32
    scf.if %7 {
      %c0_6 = arith.constant 0 : index
      %c0_7 = arith.constant 0 : index
      %8 = vector.load %arg4[%c0_6, %c0_7] : memref<80x512xf32, #tpu.memory_space<vmem>>, vector<80x512xf32>
      %c0_8 = arith.constant 0 : index
      %c0_9 = arith.constant 0 : index
      %9 = vector.load %arg3[%c0_8, %c0_9] : memref<80x512xf32, #tpu.memory_space<vmem>>, vector<80x512xf32>
      tpu.vector_store %arg3[%c0_8, %c0_9], %8 {strides = array<i32>} : memref<80x512xf32, #tpu.memory_space<vmem>>, vector<80x512xf32>,
    } else {
    }
    return
  }
  func.func @transform_0(%arg0: i32) -> i32 {
    %c0_i32 = arith.constant 0 : i32
    %c0_i32_0 = arith.constant 0 : i32
    return %c0_i32 : i32
  }
  func.func @transform_1(%arg0: i32) -> (i32, i32) {
    %c0_i32 = arith.constant 0 : i32
    %c0_i32_0 = arith.constant 0 : i32
    return %arg0, %c0_i32 : i32, i32
  }
  func.func @transform_2(%arg0: i32) -> (i32, i32) {
    %c0_i32 = arith.constant 0 : i32
    %c0_i32_0 = arith.constant 0 : i32
    %c0_i32_1 = arith.constant 0 : i32
    return %c0_i32, %c0_i32_0 : i32, i32
  }
}

</mosaic_0001>

<bundles_post_ra>
// kernel: tpu_custom_call.1
= control target key start
LH: loop header
LB: loop body
LE: loop exit
PB: predicated region body
PF: predicated region fallthrough
CT: control target
= control target key end

     0   :  { %7 = vsyncpa [#allocation6], 0  ;;  %s959_s0 = inlined_call_operand.hbm [shape: f32[1600], index: 0, kind: input, shape index: {}]   ;;  %s960_s1 = inlined_call_operand.hbm [shape: f32[8,512], index: 1, kind: input, shape index: {}]   ;;  %s961_s2 = inlined_call_operand.hbm [shape: f32[80,512], index: 2, kind: output, shape index: {}]  }
   0x1   :  { %8 = vsyncpa [#allocation4], 0 }
   0x2   :  { %9 = vsyncpa [#allocation5], 0  ;;  %s511_s11 = scalar_lea.hbm %s959_s0, 208  ;;  %s513_s16 = scalar_lea.hbm %s959_s0, 256 }
   0x3   :  { %p512_p0 = scmp.ne.s32.totalorder %s959_s0, %s511_s11  ;;  %p514_p1 = scmp.lt.u32.totalorder %s513_s16, %s511_s11 }
   0x4   :  { %p515_p2 = scmp.lt.u32.totalorder %s511_s11, %s959_s0 }
   0x6   :  { %p516_p3 = por %p515_p2, %p514_p1 }
   0x8   :  { %p517_p4 = pnand %p516_p3, %p512_p0 }
   0xa   :  { %520 = shalt.err (!%p517_p4)
}
   0xb   :  { %s579_s19 = smov [#allocation3]   ;;  %s580_s22 = smov [#allocation7]  }
   0xc   :  { %17 = dma.hbm_to_smem %s959_s0, 208, %s579_s19, [#allocation6]  }
   0xd   :  { %s24_s23 = sshll.u32 %s580_s22, 4  ;;  %s521_s26 = scalar_lea.hbm %s960_s1, 512  ;;  %s25_s23 = int_to_ptr.vmem [resolvable:$true] %s24_s23 }
   0xe   :  { %p522_p5 = scmp.ne.s32.totalorder %s960_s1, %s521_s26  ;;  %p525_p6 = scmp.lt.u32.totalorder %s521_s26, %s960_s1 }
  0x10   :  { %p527_p7 = pnand %p525_p6, %p522_p5 }
  0x12   :  { %530 = shalt.err (!%p527_p7)
}
  0x13   :  { %s531_s3 = scalar_lea.vmem %s25_s23, 512  ;;  %p536_p9 = scmp.lt.s32.totalorder %s25_s23, %s25_s23 }
  0x14   :  { %p532_p8 = scmp.ne.s32.totalorder %s25_s23, %s531_s3  ;;  %p537_p10 = scmp.lt.s32.totalorder %s531_s3, %s531_s3 }
  0x16   :  { %p538_p11 = por %p537_p10, %p536_p9 }
  0x18   :  { %p539_p12 = pnand %p538_p11, %p532_p8 }
  0x1a   :  { %542 = shalt.err (!%p539_p12)
}
  0x1b   :  { %27 = dma.hbm_to_vmem [thread:$0]  %s960_s1, 512, %s25_s23, [#allocation4]  }
  0x1c   :  { %569 = dma.done.wait [#allocation6], 208  }
  0x1d   :  { %570 = vsyncadd [#allocation6], 4294967088 }
  0x1e   :  { %571 = dma.done.wait [#allocation4], 512  }
  0x1f   :  { %572 = vsyncadd [#allocation4], 4294966784 }
  0x20   :  { %34 = sfence }
  0x21   :  { %v628_v0 = vld [vmem:[#allocation7] sm:$0xff]  ;;  %v630_v1 = vld [vmem:[#allocation7 + $0x8] sm:$0xff]  ;;  %v632_v2 = vld [vmem:[#allocation7 + $0x10] sm:$0xff]  ;;  %v581_v3 = vmov 0.0   ;;  %s636_s1 = smov 0  }
  0x22   :  { %39 = vst [vmem:[#allocation2] sm:$0xff] %v581_v3  ;;  %40 = vst [vmem:[#allocation2 + $0x8] sm:$0xff] %v581_v3  ;;  %v634_v4 = vld [vmem:[#allocation7 + $0x18] sm:$0xff] }
  0x23   :  { %41 = vst [vmem:[#allocation2 + $0x10] sm:$0xff] %v581_v3  ;;  %42 = vst [vmem:[#allocation2 + $0x18] sm:$0xff] %v581_v3 }
  0x24   :  { %43 = vst [vmem:[#allocation2 + $0x20] sm:$0xff] %v581_v3  ;;  %44 = vst [vmem:[#allocation2 + $0x28] sm:$0xff] %v581_v3 }
  0x25   :  { %45 = vst [vmem:[#allocation2 + $0x30] sm:$0xff] %v581_v3  ;;  %46 = vst [vmem:[#allocation2 + $0x38] sm:$0xff] %v581_v3 }
  0x26   :  { %47 = vst [vmem:[#allocation2 + $0x40] sm:$0xff] %v581_v3  ;;  %48 = vst [vmem:[#allocation2 + $0x48] sm:$0xff] %v581_v3 }
  0x27   :  { %49 = vst [vmem:[#allocation2 + $0x50] sm:$0xff] %v581_v3  ;;  %50 = vst [vmem:[#allocation2 + $0x58] sm:$0xff] %v581_v3 }
  0x28   :  { %51 = vst [vmem:[#allocation2 + $0x60] sm:$0xff] %v581_v3  ;;  %52 = vst [vmem:[#allocation2 + $0x68] sm:$0xff] %v581_v3 }
  0x29   :  { %53 = vst [vmem:[#allocation2 + $0x70] sm:$0xff] %v581_v3  ;;  %54 = vst [vmem:[#allocation2 + $0x78] sm:$0xff] %v581_v3 }
  0x2a   :  { %55 = vst [vmem:[#allocation2 + $0x80] sm:$0xff] %v581_v3  ;;  %56 = vst [vmem:[#allocation2 + $0x88] sm:$0xff] %v581_v3 }
  0x2b   :  { %57 = vst [vmem:[#allocation2 + $0x90] sm:$0xff] %v581_v3  ;;  %58 = vst [vmem:[#allocation2 + $0x98] sm:$0xff] %v581_v3 }
  0x2c   :  { %59 = vst [vmem:[#allocation2 + $0xa0] sm:$0xff] %v581_v3  ;;  %60 = vst [vmem:[#allocation2 + $0xa8] sm:$0xff] %v581_v3 }
  0x2d   :  { %61 = vst [vmem:[#allocation2 + $0xb0] sm:$0xff] %v581_v3  ;;  %62 = vst [vmem:[#allocation2 + $0xb8] sm:$0xff] %v581_v3 }
  0x2e   :  { %63 = vst [vmem:[#allocation2 + $0xc0] sm:$0xff] %v581_v3  ;;  %64 = vst [vmem:[#allocation2 + $0xc8] sm:$0xff] %v581_v3 }
  0x2f   :  { %65 = vst [vmem:[#allocation2 + $0xd0] sm:$0xff] %v581_v3  ;;  %66 = vst [vmem:[#allocation2 + $0xd8] sm:$0xff] %v581_v3 }
  0x30   :  { %67 = vst [vmem:[#allocation2 + $0xe0] sm:$0xff] %v581_v3  ;;  %68 = vst [vmem:[#allocation2 + $0xe8] sm:$0xff] %v581_v3 }
  0x31   :  { %69 = vst [vmem:[#allocation2 + $0xf0] sm:$0xff] %v581_v3  ;;  %70 = vst [vmem:[#allocation2 + $0xf8] sm:$0xff] %v581_v3 }
  0x32   :  { %71 = vst [vmem:[#allocation2 + $0x100] sm:$0xff] %v581_v3  ;;  %72 = vst [vmem:[#allocation2 + $0x108] sm:$0xff] %v581_v3 }
  0x33   :  { %73 = vst [vmem:[#allocation2 + $0x110] sm:$0xff] %v581_v3  ;;  %74 = vst [vmem:[#allocation2 + $0x118] sm:$0xff] %v581_v3 }
  0x34   :  { %75 = vst [vmem:[#allocation2 + $0x120] sm:$0xff] %v581_v3  ;;  %76 = vst [vmem:[#allocation2 + $0x128] sm:$0xff] %v581_v3 }
  0x35   :  { %77 = vst [vmem:[#allocation2 + $0x130] sm:$0xff] %v581_v3  ;;  %78 = vst [vmem:[#allocation2 + $0x138] sm:$0xff] %v581_v3 }
  0x36 LB: > { %s642_s5 = smul.u32 20, %s577_s1  ;;  %s577_s1 = sphi %s636_s1, %s88_s1  }
  0x38   : > { %s91_s6 = sadd.s32 1, %s642_s5  ;;  %s93_s7 = sadd.s32 2, %s642_s5 }
  0x39   : > { %s92_s8 = sld [smem:[#allocation3 + %s91_s6]]  ;;  %s95_s9 = sadd.s32 3, %s642_s5 }
  0x3a   : > { %s94_s10 = sld [smem:[#allocation3 + %s93_s7]]  ;;  %s97_s11 = sadd.s32 4, %s642_s5 }
  0x3b   : > { %s96_s12 = sld [smem:[#allocation3 + %s95_s9]]  ;;  %s99_s13 = sadd.s32 5, %s642_s5 }
  0x3c   : > { %s98_s14 = sld [smem:[#allocation3 + %s97_s11]]  ;;  %s101_s15 = sadd.s32 6, %s642_s5 }
  0x3d   : > { %s100_s16 = sld [smem:[#allocation3 + %s99_s13]]  ;;  %s103_s17 = sadd.s32 7, %s642_s5 }
  0x3e   : > { %s102_s18 = sld [smem:[#allocation3 + %s101_s15]]  ;;  %s105_s19 = sadd.s32 8, %s642_s5 }
  0x3f   : > { %s104_s20 = sld [smem:[#allocation3 + %s103_s17]]  ;;  %s107_s21 = sadd.s32 9, %s642_s5  ;;  %v660_v6 = vstv %s92_s8 }
  0x40   : > { %s106_s22 = sld [smem:[#allocation3 + %s105_s19]]  ;;  %s109_s23 = sadd.s32 10, %s642_s5  ;;  %v658_v5 = vstv %s94_s10 }
  0x41   : > { %s108_s24 = sld [smem:[#allocation3 + %s107_s21]]  ;;  %s111_s25 = sadd.s32 11, %s642_s5  ;;  %v664_v8 = vstv %s96_s12 }
  0x42   : > { %s110_s26 = sld [smem:[#allocation3 + %s109_s23]]  ;;  %s113_s27 = sadd.s32 12, %s642_s5  ;;  %v167_v10 = vstv %s98_s14 }
  0x43   : > { %s112_s28 = sld [smem:[#allocation3 + %s111_s25]]  ;;  %s115_s29 = sadd.s32 13, %s642_s5  ;;  %v162_v9 = vstv %s100_s16 }
  0x44   : > { %s116_s30 = sld [smem:[#allocation3 + %s115_s29]]  ;;  %s117_s3 = sadd.s32 14, %s642_s5  ;;  %v156_v12 = vstv %s102_s18 }
  0x45   : > { %s114_s0 = sld [smem:[#allocation3 + %s113_s27]]  ;;  %s119_s6 = sadd.s32 15, %s642_s5  ;;  %v157_v13 = vstv %s104_s20 }
  0x46   : > { %s118_s4 = sld [smem:[#allocation3 + %s117_s3]]  ;;  %v183_v14 = vstv %s106_s22  ;;  %s121_s7 = sadd.s32 16, %s642_s5 }
  0x47   : > { %s123_s9 = sadd.s32 17, %s642_s5  ;;  %v178_v18 = vstv %s108_s24  ;;  %s681_s8 = sld [smem:[#allocation3 + %s119_s6]] }
  0x48   : > { %v172_v16 = vstv %s110_s26  ;;  %s691_s10 = sld [smem:[#allocation3 + %s121_s7]]  ;;  %s322_s13 = sand.u32 7, %s577_s1 }
  0x49   : > { %v173_v17 = vstv %s112_s28  ;;  %s693_s11 = sld [smem:[#allocation3 + %s123_s9]] }
  0x4a   : > { %v667_v11 = vstv %s116_s30  ;;  %s764_s12 = sld [smem:[#allocation3 + %s642_s5]]  ;;  %s319_s5 = sshra.s32 %s577_s1, 3 }
  0x4b   : > { %v671_v15 = vstv %s114_s0  ;;  %vm131_vm4 = vcmp.lt.f32.partialorder %v628_v0, %v667_v11  ;;  %vm132_vm5 = vcmp.lt.f32.partialorder %v630_v1, %v667_v11  ;;  %vm967_vm6 = vcmp.lt.f32.partialorder %v632_v2, %v667_v11  ;;  %s475_s14 = sshll.u32 %s319_s5, 5  ;;  %s88_s1 = sadd.s32 1, %s577_s1  }
  0x4c   : > { %v662_v7 = vstv %s118_s4  ;;  %vm966_vm7 = vcmp.lt.f32.partialorder %v634_v4, %v667_v11  ;;  %vm965_vm8 = vcmp.lt.f32.partialorder %v628_v0, %v671_v15  ;;  %vm964_vm9 = vcmp.lt.f32.partialorder %v630_v1, %v671_v15  ;;  %s325_s15 = sadd.s32 %s475_s14, %s322_s13  ;;  %p85_p13 = scmp.ge.s32.totalorder %s88_s1, 80  }
  0x4d   : > { %vm136_vm0 = vcmp.lt.f32.partialorder %v628_v0, %v662_v7  ;;  %vm137_vm1 = vcmp.lt.f32.partialorder %v630_v1, %v662_v7  ;;  %vm138_vm2 = vcmp.lt.f32.partialorder %v632_v2, %v662_v7  ;;  %vm139_vm3 = vcmp.lt.f32.partialorder %v634_v4, %v662_v7  ;;  %s326_s16 = scalar_lea.vmem [#allocation2], %s325_s15  ;;  %s583_s1 = smov (%p85_p13), [#allocation8]  }
  0x4e   : > { %vm963_vm10 = vcmp.lt.f32.partialorder %v632_v2, %v671_v15  ;;  %vm962_vm11 = vcmp.lt.f32.partialorder %v634_v4, %v671_v15  ;;  %v158_v19 = vsel %vm136_vm0, %v156_v12, %v157_v13  ;;  %v159_v20 = vsel %vm137_vm1, %v156_v12, %v157_v13  ;;  %s452_s17 = sshll.u32 (%p85_p13), %s583_s1, 4  ;;  %s453_s17 = int_to_ptr.vmem [resolvable:$true] %s452_s17 }
  0x4f   : > { %v160_v21 = vsel %vm138_vm2, %v156_v12, %v157_v13  ;;  %v161_v22 = vsel %vm139_vm3, %v156_v12, %v157_v13  ;;  %v163_v23 = vsel %vm131_vm4, %v162_v9, %v158_v19  ;;  %v164_v24 = vsel %vm132_vm5, %v162_v9, %v159_v20  ;;  %s543_s18 = scalar_lea.vmem (%p85_p13), %s453_s17, 5120  ;;  %p548_p1 = scmp.lt.s32.totalorder (%p85_p13), %s453_s17, %s453_s17 }
  0x50   : > { %v165_v25 = vsel %vm967_vm6, %v162_v9, %v160_v21  ;;  %v166_v26 = vsel %vm966_vm7, %v162_v9, %v161_v22  ;;  %v168_v27 = vsel %vm965_vm8, %v167_v10, %v163_v23  ;;  %v169_v28 = vsel %vm964_vm9, %v167_v10, %v164_v24  ;;  %p544_p0 = scmp.ne.s32.totalorder (%p85_p13), %s453_s17, %s543_s18  ;;  %p549_p2 = scmp.lt.s32.totalorder (%p85_p13), %s543_s18, %s543_s18 }
  0x51   : > { %v170_v29 = vsel %vm963_vm10, %v167_v10, %v165_v25  ;;  %v171_v30 = vsel %vm962_vm11, %v167_v10, %v166_v26  ;;  %v174_v31 = vsel %vm136_vm0, %v172_v16, %v173_v17  ;;  %v175_v32 = vsel %vm137_vm1, %v172_v16, %v173_v17 }
  0x52   : > { %v176_v33 = vsel %vm138_vm2, %v172_v16, %v173_v17  ;;  %v177_v34 = vsel %vm139_vm3, %v172_v16, %v173_v17  ;;  %v179_v35 = vsel %vm131_vm4, %v178_v18, %v174_v31  ;;  %v180_v36 = vsel %vm132_vm5, %v178_v18, %v175_v32  ;;  %p550_p3 = por (%p85_p13), %p549_p2, %p548_p1 }
  0x53   : > { %v181_v37 = vsel %vm967_vm6, %v178_v18, %v176_v33  ;;  %v182_v38 = vsel %vm966_vm7, %v178_v18, %v177_v34  ;;  %v142_v39 = vsel %vm136_vm0, %v658_v5, %v664_v8  ;;  %v774_v40 = vsel %vm965_vm8, %v183_v14, %v179_v35 }
  0x54   : > { %v779_v41 = vsel %vm964_vm9, %v183_v14, %v180_v36  ;;  %v784_v42 = vsel %vm963_vm10, %v183_v14, %v181_v37  ;;  %v188_v43 = vmul.f32 %v168_v27, %v628_v0  ;;  %v189_v44 = vmul.f32 %v169_v28, %v630_v1  ;;  %p551_p4 = pnand (%p85_p13), %p550_p3, %p544_p0 }
  0x55   : > { %v190_v45 = vmul.f32 %v170_v29, %v632_v2  ;;  %v191_v46 = vmul.f32 %v171_v30, %v634_v4  ;;  %v793_v47 = vsel %vm962_vm11, %v183_v14, %v182_v38  ;;  %v204_v48 = vstv %s693_s11 }
  0x56   : > { %v217_v49 = vstv %s691_s10  ;;  %v222_v50 = vstv %s681_s8  ;;  %v476_v51 = vround.rtne.f32 %v188_v43  ;;  %v477_v52 = vround.rtne.f32 %v189_v44 }
  0x57   : > { %v478_v53 = vround.rtne.f32 %v190_v45  ;;  %v479_v54 = vround.rtne.f32 %v191_v46  ;;  %vm218_vm12 = vcmp.lt.f32.partialorder %v217_v49, %v628_v0  ;;  %vm219_vm13 = vcmp.lt.f32.partialorder %v217_v49, %v630_v1 }
  0x58   : > { %vm220_vm14 = vcmp.lt.f32.partialorder %v217_v49, %v632_v2  ;;  %vm221_vm15 = vcmp.lt.f32.partialorder %v217_v49, %v634_v4  ;;  %v196_v55 = vadd.f32 %v476_v51, %v774_v40  ;;  %v197_v56 = vadd.f32 %v477_v52, %v779_v41 }
  0x59   : > { %v198_v57 = vadd.f32 %v478_v53, %v784_v42  ;;  %v199_v58 = vadd.f32 %v479_v54, %v793_v47  ;;  %vm223_vm0 = vcmp.lt.f32.partialorder %v628_v0, %v222_v50  ;;  %vm224_vm11 = vcmp.lt.f32.partialorder %v630_v1, %v222_v50 }
  0x5a   : > { %vm225_vm10 = vcmp.lt.f32.partialorder %v632_v2, %v222_v50  ;;  %vm226_vm9 = vcmp.lt.f32.partialorder %v634_v4, %v222_v50  ;;  %v200_v59 = vmax.f32 %v196_v55, 0.0  ;;  %v201_v60 = vmax.f32 %v197_v56, 0.0  ;;  %vm812_vm8 = vmand %vm218_vm12, %vm223_vm0 }
  0x5b   : > { %v202_v61 = vmax.f32 %v198_v57, 0.0  ;;  %v203_v62 = vmax.f32 %v199_v58, 0.0  ;;  %v143_v3 = vsel %vm137_vm1, %v658_v5, %v664_v8  ;;  %v151_v9 = vstv %s764_s12  ;;  %vm824_vm7 = vmand %vm219_vm13, %vm224_vm11 }
  0x5c   : > { %vm231_vm6 = vcmp.ne.f32.partialorder %v628_v0, %v671_v15  ;;  %v144_v12 = vsel %vm138_vm2, %v658_v5, %v664_v8  ;;  %v205_v13 = vmin.f32 %v204_v48, %v200_v59  ;;  %v206_v14 = vmin.f32 %v204_v48, %v201_v60  ;;  %vm837_vm1 = vmand %vm220_vm14, %vm225_vm10 }
  0x5d   : > { %vm232_vm11 = vcmp.ne.f32.partialorder %v630_v1, %v671_v15  ;;  %v145_v17 = vsel %vm139_vm3, %v658_v5, %v664_v8  ;;  %v147_v18 = vsel %vm131_vm4, %v660_v6, %v142_v39  ;;  %v207_v19 = vmin.f32 %v204_v48, %v202_v61  ;;  %vm856_vm2 = vmand %vm221_vm15, %vm226_vm9 }
  0x5e   : > { %vm233_vm10 = vcmp.ne.f32.partialorder %v632_v2, %v671_v15  ;;  %v148_v5 = vsel %vm132_vm5, %v660_v6, %v143_v3  ;;  %v208_v8 = vmin.f32 %v204_v48, %v203_v62  ;;  %vm234_vm3 = vcmp.ne.f32.partialorder %v634_v4, %v671_v15  ;;  %vm870_vm4 = vmand %vm812_vm8, %vm231_vm6 }
  0x5f   : > { %vm978_vm9 = vcmp.lt.f32.partialorder %v632_v2, %v667_v11  ;;  %v209_v23 = vsub.f32 %v205_v13, %v774_v40  ;;  %vm881_vm5 = vmand %vm824_vm7, %vm232_vm11  ;;  %vm239_vm12 = vcmp.ne.f32.partialorder %v628_v0, %v667_v11  ;;  %vm981_vm6 = vcmp.lt.f32.partialorder %v634_v4, %v667_v11 }
  0x60   : > { %v149_v22 = vsel %vm978_vm9, %v660_v6, %v144_v12  ;;  %v150_v25 = vsel %vm981_vm6, %v660_v6, %v145_v17  ;;  %vm982_vm8 = vcmp.lt.f32.partialorder %v628_v0, %v671_v15  ;;  %v210_v27 = vsub.f32 %v206_v14, %v779_v41  ;;  %vm897_vm7 = vmand %vm837_vm1, %vm233_vm10 }
  0x61   : > { %v152_v26 = vsel %vm982_vm8, %v151_v9, %v147_v18  ;;  %vm240_vm13 = vcmp.ne.f32.partialorder %v630_v1, %v667_v11  ;;  %vm985_vm14 = vcmp.lt.f32.partialorder %v630_v1, %v671_v15  ;;  %v211_v6 = vsub.f32 %v207_v19, %v784_v42  ;;  %vm238_vm15 = vmand %vm856_vm2, %vm234_vm3 }
  0x62   : > { %v153_v29 = vsel %vm985_vm14, %v151_v9, %v148_v5  ;;  %vm241_vm0 = vcmp.ne.f32.partialorder %v632_v2, %v667_v11  ;;  %vm986_vm1 = vcmp.lt.f32.partialorder %v632_v2, %v671_v15  ;;  %v212_v31 = vsub.f32 %v208_v8, %v793_v47  ;;  %vm243_vm10 = vmand %vm870_vm4, %vm239_vm12 }
  0x63   : > { %v154_v30 = vsel %vm986_vm1, %v151_v9, %v149_v22  ;;  %vm242_vm11 = vcmp.ne.f32.partialorder %v634_v4, %v667_v11  ;;  %vm987_vm9 = vcmp.lt.f32.partialorder %v634_v4, %v671_v15  ;;  %v213_v33 = vmul.f32 %v209_v23, %v152_v26  ;;  %vm244_vm2 = vmand %vm881_vm5, %vm240_vm13 }
  0x64   : > { %v155_v32 = vsel %vm987_vm9, %v151_v9, %v150_v25  ;;  %vm247_vm3 = vcmp.ne.f32.partialorder %v628_v0, %v662_v7  ;;  %v214_v34 = vmul.f32 %v210_v27, %v153_v29  ;;  %vm245_vm6 = vmand %vm897_vm7, %vm241_vm0  ;;  %vm248_vm8 = vcmp.ne.f32.partialorder %v630_v1, %v662_v7 }
  0x65   : > { %v215_v11 = vmul.f32 %v211_v6, %v154_v30  ;;  %vm246_vm4 = vmand %vm238_vm15, %vm242_vm11  ;;  %vm249_vm12 = vcmp.ne.f32.partialorder %v632_v2, %v662_v7  ;;  %v216_v15 = vmul.f32 %v212_v31, %v155_v32  ;;  %vm250_vm14 = vcmp.ne.f32.partialorder %v634_v4, %v662_v7 }
  0x66   : > { %vm251_vm5 = vmand %vm243_vm10, %vm247_vm3  ;;  %v582_v8 = vmov 1966171168   ;;  %v337_v22 = vlaneseq }
  0x67   : > { %vm252_vm13 = vmand %vm244_vm2, %vm248_vm8  ;;  %v255_v35 = vsel %vm251_vm5, %v213_v33, %v628_v0  ;;  %v335_v21 = vunpack.c.l.s4 %v582_v8 }
  0x68   : > { %vm253_vm1 = vmand %vm245_vm6, %vm249_vm12  ;;  %v256_v36 = vsel %vm252_vm13, %v214_v34, %v630_v1  ;;  %v259_v37 = vsub.f32 %v628_v0, %v255_v35  ;;  %v338_v31 = vshrl.u32 %v337_v22, 7  ;;  %vm360_vm9 = vcmp.lt.s32.totalorder %v337_v22, 512 }
  0x69   : > { %vm254_vm7 = vmand %vm246_vm4, %vm250_vm14  ;;  %v257_v38 = vsel %vm253_vm1, %v215_v11, %v632_v2  ;;  %v260_v39 = vsub.f32 %v630_v1, %v256_v36  ;;  %v336_v30 = vunpack.c.0.s8 %v335_v21 }
  0x6a   : > { %v258_v40 = vsel %vm254_vm7, %v216_v15, %v634_v4  ;;  %v261_v41 = vsub.f32 %v632_v2, %v257_v38  ;;  %v263_v42 = vand.u32 2147483647, %v259_v37 }
  0x6b   : > { %v262_v7 = vsub.f32 %v634_v4, %v258_v40  ;;  %v264_v43 = vand.u32 2147483647, %v260_v39  ;;  %v339_v38 = vsub.s32 %v336_v30, %v338_v31 }
  0x6c   : > { %v265_v44 = vand.u32 2147483647, %v261_v41  ;;  %495 = vlog2.f32 %v263_v42  ;;  %vm267_vm15 = vcmp.gt.f32.partialorder %v263_v42, 0.0 }
  0x6d   : > { %v266_v45 = vand.u32 2147483647, %v262_v7  ;;  %497 = vlog2.f32 %v264_v43  ;;  %vm268_vm0 = vcmp.gt.f32.partialorder %v264_v43, 0.0 }
  0x6e   : > { %499 = vlog2.f32 %v265_v44  ;;  %vm269_vm11 = vcmp.gt.f32.partialorder %v265_v44, 0.0 }
  0x6f   : > { %501 = vlog2.f32 %v266_v45  ;;  %vm270_vm10 = vcmp.gt.f32.partialorder %v266_v45, 0.0  ;;  %v327_v45 = vld [vmem:[%s326_s16] ss:$8 sm:$0xf] }
  0x76   : > { %v496_v46 = vpop.eup %495 }
  0x77   : > { %v498_v47 = vpop.eup %497  ;;  %v272_v48 = vmul.f32 0.6931472, %v496_v46 }
  0x78   : > { %v500_v49 = vpop.eup %499  ;;  %v274_v50 = vmul.f32 0.6931472, %v498_v47 }
  0x79   : > { %v502_v51 = vpop.eup %501  ;;  %v276_v52 = vmul.f32 0.6931472, %v500_v49  ;;  %v279_v53 = vmul.f32 2.4, %v272_v48 }
  0x7a   : > { %v278_v54 = vmul.f32 0.6931472, %v502_v51  ;;  %v280_v55 = vmul.f32 2.4, %v274_v50 }
  0x7b   : > { %v281_v56 = vmul.f32 2.4, %v276_v52  ;;  %v283_v57 = vmul.f32 1.442695, %v279_v53 }
  0x7c   : > { %v282_v58 = vmul.f32 2.4, %v278_v54  ;;  %v285_v59 = vmul.f32 1.442695, %v280_v55 }
  0x7d   : > { %503 = vpow2.f32 %v283_v57  ;;  %v287_v60 = vmul.f32 1.442695, %v281_v56 }
  0x7e   : > { %505 = vpow2.f32 %v285_v59  ;;  %v289_v61 = vmul.f32 1.442695, %v282_v58 }
  0x7f   : > { %507 = vpow2.f32 %v287_v60 }
  0x80   : > { %509 = vpow2.f32 %v289_v61 }
  0x87   : > { %v504_v62 = vpop.eup %503 }
  0x88   : > { %v506_v63 = vpop.eup %505  ;;  %v291_v3 = vsel %vm267_vm15, %v504_v62, 0.0 }
  0x89   : > { %v508_v9 = vpop.eup %507  ;;  %v292_v10 = vsel %vm268_vm0, %v506_v63, 0.0  ;;  %v295_v12 = vrot.slane %v291_v3, 4 }
  0x8a   : > { %v510_v13 = vpop.eup %509  ;;  %v293_v14 = vsel %vm269_vm11, %v508_v9, 0.0  ;;  %v301_v16 = vrot.slane %v292_v10, 4 }
  0x8b   : > { %v294_v17 = vsel %vm270_vm10, %v510_v13, 0.0  ;;  %v296_v18 = vadd.f32 %v295_v12, %v291_v3  ;;  %v307_v19 = vrot.slane %v293_v14, 4 }
  0x8c   : > { %v302_v20 = vadd.f32 %v301_v16, %v292_v10  ;;  %v313_v5 = vrot.slane %v294_v17, 4 }
  0x8d   : > { %v297_v23 = vrot.slane %v296_v18, 2  ;;  %v308_v24 = vadd.f32 %v307_v19, %v293_v14 }
  0x8e   : > { %v303_v25 = vrot.slane %v302_v20, 2  ;;  %v314_v26 = vadd.f32 %v313_v5, %v294_v17 }
  0x8f   : > { %v298_v27 = vadd.f32 %v297_v23, %v296_v18  ;;  %v309_v28 = vrot.slane %v308_v24, 2 }
  0x90   : > { %v304_v29 = vadd.f32 %v303_v25, %v302_v20  ;;  %v315_v6 = vrot.slane %v314_v26, 2 }
  0x91   : > { %v299_v32 = vrot.slane %v298_v27, 1  ;;  %v310_v33 = vadd.f32 %v309_v28, %v308_v24 }
  0x92   : > { %v305_v34 = vrot.slane %v304_v29, 1  ;;  %v316_v11 = vadd.f32 %v315_v6, %v314_v26 }
  0x93   : > { %v300_v15 = vadd.f32 %v299_v32, %v298_v27  ;;  %v311_v35 = vrot.slane %v310_v33, 1 }
  0x94   : > { %v306_v36 = vadd.f32 %v305_v34, %v304_v29  ;;  %v317_v37 = vrot.slane %v316_v11, 1 }
  0x95   : > { %v312_v39 = vadd.f32 %v311_v35, %v310_v33 }
  0x96   : > { %v318_v40 = vadd.f32 %v317_v37, %v316_v11  ;;  %v332_v41 = vcombine.low %v300_v15, %v306_v36 }
  0x98   : > { %v333_v42 = vcombine.low %v312_v39, %v318_v40  ;;  %v340_v7 = vrot.slane %v332_v41, %v339_v38 }
  0x9a   : > { %v347_v43 = vrot.slane %v333_v42, %v339_v38 }
  0x9c   : > { %v348_v44 = vcombine.low %v340_v7, %v347_v43  ;;  %87 = sbr.rel (!%p85_p13) target bundleno = 54 (0x36), region = 52 }
  0x9e   : > { %v355_v46 = vrot.slane %v348_v44, %v339_v38 }
  0xa0   : > { %v357_v47 = vadd.f32 %v355_v46, %v327_v45 }
  0xa2   : > { %362 = vst.msk [vmem:[%s326_s16] ss:$8 sm:$0xf] %vm360_vm9, %v357_v47 }
  0xa9   :  { %v367_v48 = vld [vmem:[#allocation2] sm:$0xff]  ;;  %v368_v49 = vld [vmem:[#allocation2 + $0x8] sm:$0xff]  ;;  %v369_v50 = vld [vmem:[#allocation2 + $0x10] sm:$0xff] }
  0xaa   :  { %407 = vst [vmem:[#allocation8] sm:$0xff] %v367_v48  ;;  %408 = vst [vmem:[#allocation8 + $0x8] sm:$0xff] %v368_v49  ;;  %v370_v51 = vld [vmem:[#allocation2 + $0x18] sm:$0xff]  ;;  %v371_v52 = vld [vmem:[#allocation2 + $0x20] sm:$0xff] }
  0xab   :  { %409 = vst [vmem:[#allocation8 + $0x10] sm:$0xff] %v369_v50  ;;  %v372_v53 = vld [vmem:[#allocation2 + $0x28] sm:$0xff]  ;;  %410 = vst [vmem:[#allocation8 + $0x18] sm:$0xff] %v370_v51  ;;  %v373_v54 = vld [vmem:[#allocation2 + $0x30] sm:$0xff] }
  0xac   :  { %411 = vst [vmem:[#allocation8 + $0x20] sm:$0xff] %v371_v52  ;;  %412 = vst [vmem:[#allocation8 + $0x28] sm:$0xff] %v372_v53  ;;  %v374_v55 = vld [vmem:[#allocation2 + $0x38] sm:$0xff]  ;;  %v375_v56 = vld [vmem:[#allocation2 + $0x40] sm:$0xff] }
  0xad   :  { %413 = vst [vmem:[#allocation8 + $0x30] sm:$0xff] %v373_v54  ;;  %414 = vst [vmem:[#allocation8 + $0x38] sm:$0xff] %v374_v55  ;;  %v376_v57 = vld [vmem:[#allocation2 + $0x48] sm:$0xff]  ;;  %v377_v58 = vld [vmem:[#allocation2 + $0x50] sm:$0xff] }
  0xae   :  { %415 = vst [vmem:[#allocation8 + $0x40] sm:$0xff] %v375_v56  ;;  %v378_v0 = vld [vmem:[#allocation2 + $0x58] sm:$0xff]  ;;  %416 = vst [vmem:[#allocation8 + $0x48] sm:$0xff] %v376_v57  ;;  %v379_v1 = vld [vmem:[#allocation2 + $0x60] sm:$0xff] }
  0xaf   :  { %417 = vst [vmem:[#allocation8 + $0x50] sm:$0xff] %v377_v58  ;;  %418 = vst [vmem:[#allocation8 + $0x58] sm:$0xff] %v378_v0  ;;  %v380_v2 = vld [vmem:[#allocation2 + $0x68] sm:$0xff]  ;;  %v381_v4 = vld [vmem:[#allocation2 + $0x70] sm:$0xff] }
  0xb0   :  { %419 = vst [vmem:[#allocation8 + $0x60] sm:$0xff] %v379_v1  ;;  %420 = vst [vmem:[#allocation8 + $0x68] sm:$0xff] %v380_v2  ;;  %v382_v59 = vld [vmem:[#allocation2 + $0x78] sm:$0xff]  ;;  %v383_v60 = vld [vmem:[#allocation2 + $0x80] sm:$0xff] }
  0xb1   :  { %421 = vst [vmem:[#allocation8 + $0x70] sm:$0xff] %v381_v4  ;;  %v384_v61 = vld [vmem:[#allocation2 + $0x88] sm:$0xff]  ;;  %422 = vst [vmem:[#allocation8 + $0x78] sm:$0xff] %v382_v59  ;;  %v385_v62 = vld [vmem:[#allocation2 + $0x90] sm:$0xff] }
  0xb2   :  { %423 = vst [vmem:[#allocation8 + $0x80] sm:$0xff] %v383_v60  ;;  %424 = vst [vmem:[#allocation8 + $0x88] sm:$0xff] %v384_v61  ;;  %v386_v63 = vld [vmem:[#allocation2 + $0x98] sm:$0xff]  ;;  %v387_v3 = vld [vmem:[#allocation2 + $0xa0] sm:$0xff] }
  0xb3   :  { %425 = vst [vmem:[#allocation8 + $0x90] sm:$0xff] %v385_v62  ;;  %426 = vst [vmem:[#allocation8 + $0x98] sm:$0xff] %v386_v63  ;;  %v388_v9 = vld [vmem:[#allocation2 + $0xa8] sm:$0xff]  ;;  %v389_v10 = vld [vmem:[#allocation2 + $0xb0] sm:$0xff] }
  0xb4   :  { %427 = vst [vmem:[#allocation8 + $0xa0] sm:$0xff] %v387_v3  ;;  %v390_v12 = vld [vmem:[#allocation2 + $0xb8] sm:$0xff]  ;;  %428 = vst [vmem:[#allocation8 + $0xa8] sm:$0xff] %v388_v9  ;;  %v391_v13 = vld [vmem:[#allocation2 + $0xc0] sm:$0xff] }
  0xb5   :  { %429 = vst [vmem:[#allocation8 + $0xb0] sm:$0xff] %v389_v10  ;;  %430 = vst [vmem:[#allocation8 + $0xb8] sm:$0xff] %v390_v12  ;;  %v392_v14 = vld [vmem:[#allocation2 + $0xc8] sm:$0xff]  ;;  %v393_v16 = vld [vmem:[#allocation2 + $0xd0] sm:$0xff] }
  0xb6   :  { %431 = vst [vmem:[#allocation8 + $0xc0] sm:$0xff] %v391_v13  ;;  %432 = vst [vmem:[#allocation8 + $0xc8] sm:$0xff] %v392_v14  ;;  %v394_v17 = vld [vmem:[#allocation2 + $0xd8] sm:$0xff]  ;;  %v395_v18 = vld [vmem:[#allocation2 + $0xe0] sm:$0xff] }
  0xb7   :  { %433 = vst [vmem:[#allocation8 + $0xd0] sm:$0xff] %v393_v16  ;;  %v396_v19 = vld [vmem:[#allocation2 + $0xe8] sm:$0xff]  ;;  %434 = vst [vmem:[#allocation8 + $0xd8] sm:$0xff] %v394_v17  ;;  %v397_v20 = vld [vmem:[#allocation2 + $0xf0] sm:$0xff] }
  0xb8   :  { %435 = vst [vmem:[#allocation8 + $0xe0] sm:$0xff] %v395_v18  ;;  %436 = vst [vmem:[#allocation8 + $0xe8] sm:$0xff] %v396_v19  ;;  %v398_v5 = vld [vmem:[#allocation2 + $0xf8] sm:$0xff]  ;;  %v399_v8 = vld [vmem:[#allocation2 + $0x100] sm:$0xff] }
  0xb9   :  { %437 = vst [vmem:[#allocation8 + $0xf0] sm:$0xff] %v397_v20  ;;  %438 = vst [vmem:[#allocation8 + $0xf8] sm:$0xff] %v398_v5  ;;  %v400_v21 = vld [vmem:[#allocation2 + $0x108] sm:$0xff]  ;;  %v401_v22 = vld [vmem:[#allocation2 + $0x110] sm:$0xff] }
  0xba   :  { %439 = vst [vmem:[#allocation8 + $0x100] sm:$0xff] %v399_v8  ;;  %v402_v23 = vld [vmem:[#allocation2 + $0x118] sm:$0xff]  ;;  %440 = vst [vmem:[#allocation8 + $0x108] sm:$0xff] %v400_v21  ;;  %v403_v24 = vld [vmem:[#allocation2 + $0x120] sm:$0xff] }
  0xbb   :  { %441 = vst [vmem:[#allocation8 + $0x110] sm:$0xff] %v401_v22  ;;  %442 = vst [vmem:[#allocation8 + $0x118] sm:$0xff] %v402_v23  ;;  %v404_v25 = vld [vmem:[#allocation2 + $0x128] sm:$0xff]  ;;  %v405_v26 = vld [vmem:[#allocation2 + $0x130] sm:$0xff] }
  0xbc   :  { %443 = vst [vmem:[#allocation8 + $0x120] sm:$0xff] %v403_v24  ;;  %444 = vst [vmem:[#allocation8 + $0x128] sm:$0xff] %v404_v25  ;;  %v406_v27 = vld [vmem:[#allocation2 + $0x138] sm:$0xff] }
  0xbd   :  { %445 = vst [vmem:[#allocation8 + $0x130] sm:$0xff] %v405_v26  ;;  %446 = vst [vmem:[#allocation8 + $0x138] sm:$0xff] %v406_v27 }
  0xbe   :  { %554 = shalt.err (!%p551_p4)
}
  0xbf   :  { %s555_s21 = scalar_lea.hbm %s961_s2, 5120 }
  0xc0   :  { %p556_p5 = scmp.ne.s32.totalorder %s961_s2, %s555_s21  ;;  %p559_p6 = scmp.lt.u32.totalorder %s555_s21, %s961_s2 }
  0xc2   :  { %p561_p7 = pnand %p559_p6, %p556_p5 }
  0xc4   :  { %564 = shalt.err (!%p561_p7)
}
  0xc5   :  { %s584_s26 = smov 512   ;;  %s585_s27 = smov 32  }
  0xc6   :  { %458 = dma.vmem_to_hbm [thread:$0]  %s453_s17, 5120, %s961_s2, [#allocation5], %s584_s26, %s584_s26, %s585_s27  }
  0xc7   :  { %573 = dma.done.wait [#allocation5], 5120  }
  0xc8   :  { %574 = vsyncadd [#allocation5], 4294962176 }
  0xc9   :  { %462 = vsyncpa [#allocation4], 1 }
  0xca   :  { %463 = vsyncpa [#allocation5], 1 }
  0xcb   :  { %464 = vsyncpa [#allocation6], 1 }

</bundles_post_ra>
